<compile_context>
chip_gen: v6e
topology: v6e:2x2x1
jax: 0.10.0
libtpu: 0.0.40
codegen_flags: <defaults>
</compile_context>

<pallas_src>
import functools
import math

import jax
import jax.numpy as jnp
from jax import lax
from jax.experimental import pallas as pl
from jax.experimental.pallas import tpu as pltpu


def _crnn_kernel(x_ref, w_ref, o_ref, *, Nb, N_total, C, L, K, left, right):
    # x_ref: (Nb, C, L)  input tile, PyTorch NCL layout
    # w_ref: (F, K*C+1)  conv weights with BN scale folded in + shift column
    # o_ref: (Nb, F, L)  output tile, PyTorch NCL layout
    w = w_ref[...]                                      # (F, K*C+1)
    ones_row = jnp.ones((1, L), dtype=x_ref.dtype)      # hoisted, loop invariant

    def compute_row(n):
        xb = x_ref[n]                                   # (C, L)
        # 'same' padding along the length (lane) axis, per batch row so live
        # temporaries are per-row, not per-tile.
        if left or right:
            parts = []
            if left:
                parts.append(jnp.zeros((C, left), xb.dtype))
            parts.append(xb)
            if right:
                parts.append(jnp.zeros((C, right), xb.dtype))
            xp = jnp.concatenate(parts, axis=-1)        # (C, L+K-1)
        else:
            xp = xb
        # Fuse the K taps into one contraction of depth K*C, plus the ones row
        # that multiplies the folded bias/BN shift column of w.
        if K > 1:
            taps = jnp.concatenate([xp[:, k:k + L] for k in range(K)], axis=0)
        else:
            taps = xp                                   # (K*C, L)
        taps = jnp.concatenate([taps, ones_row], axis=0)            # (K*C+1, L)
        # (F, K*C+1) @ (K*C+1, L) -> (F, L): exactly the NCL output layout, so
        # the store into o_ref[n] is a direct sublane(F) x lane(L) write.
        y = jnp.dot(w, taps, preferred_element_type=jnp.float32)
        y = jnp.maximum(y, 0.0)          # ReLU; MaxPool1d(1) / Dropout(eval) = identity
        o_ref[n] = y.astype(o_ref.dtype)

    guard = (N_total % Nb) != 0          # only the last tile can have OOB rows

    def compute_row_safe(n):
        if guard:
            # OOB rows of the partial last tile are masked on writeback anyway;
            # skipping them just avoids wasted MXU work on stale VMEM contents.
            @pl.when(pl.program_id(0) * Nb + n < N_total)
            def _():
                compute_row(n)
        else:
            compute_row(n)

    if Nb <= 16:
        for n in range(Nb):              # static unroll: full scheduler visibility
            compute_row_safe(n)
    else:
        # Large batch tiles: loop instead of unrolling (removes the old nb<=8 cap).
        def body(n, carry):
            compute_row_safe(n)
            return carry
        lax.fori_loop(0, Nb, body, 0)


def crnn_block_forward(x_ncl, weight, bias, gamma, beta, running_mean, running_var,
                       eps=1e-5, compute_dtype=jnp.float32, out_dtype=None):
    """x_ncl: (N, C_in, L); weight: (F, C_in, K) — PyTorch Conv1d conventions.

    Returns (N, F, L) in `out_dtype` (defaults to compute_dtype).  Pass
    compute_dtype=jnp.bfloat16 to run the matmul bf16-native and halve both
    input and output HBM traffic (accumulation stays f32); the f32 default
    matches PyTorch numerics.
    """
    N, C_in, L = x_ncl.shape
    F_out, _, K = weight.shape
    if out_dtype is None:
        out_dtype = compute_dtype

    # PyTorch padding='same' (stride=1): left = (K-1)//2, right = rest.
    total = K - 1
    left = total // 2
    right = total - left

    # Fold BatchNorm running stats + conv bias into the weights; the shift
    # becomes one extra contraction column (matched by a ones row in-kernel).
    scale = gamma / jnp.sqrt(running_var + eps)                       # (F,)
    w_fold = weight.astype(jnp.float32) * scale[:, None, None]        # (F, C, K)
    # contraction ordering j = k*C + c must match the kernel's tap-major concat
    w_fkc = jnp.transpose(w_fold, (0, 2, 1)).reshape(F_out, K * C_in)
    shift = (bias * scale + beta - running_mean * scale).reshape(F_out, 1)
    w_aug = jnp.concatenate([w_fkc, shift], axis=1)                   # (F, K*C+1)

    x_in = x_ncl.astype(compute_dtype)
    w_in = w_aug.astype(compute_dtype)

    in_item = jnp.dtype(compute_dtype).itemsize
    out_item = jnp.dtype(out_dtype).itemsize

    # ---- generation-aware tile sizing -------------------------------------
    try:
        vmem_capacity = int(pltpu.get_tpu_info().vmem_capacity_bytes)
        # v7x: 64 MiB VMEM per TensorCore and 2 TCs; v5e/v6e: 128 MiB, 1 TC.
        multi_tc = vmem_capacity <= (64 * 1024 * 1024)
    except Exception:
        vmem_capacity = 64 * 1024 * 1024   # conservative default
        multi_tc = True

    # Single-copy (in + out) block bytes per grid step.
    block_budget = min(max(vmem_capacity // 6, 4 * 1024 * 1024), 20 * 1024 * 1024)
    per_elem = C_in * L * in_item + F_out * L * out_item
    nb = max(1, block_budget // per_elem)
    if multi_tc and N >= 2:
        # Keep >= 2 grid steps so both v7x TensorCores get work.
        nb = min(nb, pl.cdiv(N, 2))
    nb = max(1, min(nb, N))

    # VMEM accounting: 2x double-buffered blocks + weights + per-row temporaries.
    w_bytes = F_out * (K * C_in + 1) * in_item
    temps = ((C_in * (L + total) + (K * C_in + 1) * L) * in_item
             + F_out * L * 4 + F_out * L * out_item)
    limit_cap = int(vmem_capacity * 3 // 4)

    def _need(nb_):
        return 2 * (nb_ * per_elem + w_bytes) + temps + (2 << 20)

    while nb > 1 and _need(nb) > limit_cap:
        nb = max(1, nb // 2)
    vmem_limit = int(min(max(_need(nb), 32 * 1024 * 1024), limit_cap))

    grid = pl.cdiv(N, nb)

    kernel = functools.partial(_crnn_kernel, Nb=nb, N_total=N, C=C_in, L=L,
                               K=K, left=left, right=right)

    cost = pl.CostEstimate(
        flops=int(2 * N * F_out * L * (K * C_in + 1)),
        transcendentals=0,
        bytes_accessed=int(N * C_in * L * in_item + N * F_out * L * out_item + w_bytes),
    )

    return pl.pallas_call(
        kernel,
        out_shape=jax.ShapeDtypeStruct((N, F_out, L), out_dtype),
        grid_spec=pltpu.PrefetchScalarGridSpec(
            num_scalar_prefetch=0,
            grid=(grid,),
            in_specs=[
                pl.BlockSpec((nb, C_in, L), lambda i: (i, 0, 0)),
                pl.BlockSpec((F_out, K * C_in + 1), lambda i: (0, 0)),
            ],
            out_specs=pl.BlockSpec((nb, F_out, L), lambda i: (i, 0, 0)),
        ),
        compiler_params=pltpu.CompilerParams(
            dimension_semantics=("parallel",),
            vmem_limit_bytes=vmem_limit),
        cost_estimate=cost,
    )(x_in, w_in)


def _reference(x, weight, bias, gamma, beta, mean, var, eps=1e-5):
    # Pure-JAX eval-mode reference for the CRNN block.
    N, C, L = x.shape
    F_out, _, K = weight.shape
    total = K - 1
    left = total // 2
    right = total - left
    xp = jnp.pad(x, ((0, 0), (0, 0), (left, right)))
    out = jnp.zeros((N, F_out, L), jnp.float32)
    for k in range(K):
        out = out + jnp.einsum('fc,ncl->nfl', weight[:, :, k], xp[:, :, k:k + L])
    out = out + bias[None, :, None]
    scale = gamma / jnp.sqrt(var + eps)
    out = out * scale[None, :, None] + (beta - mean * scale)[None, :, None]
    return jnp.maximum(out, 0.0)


if __name__ == "__main__":
    # Module hyper-parameters (small, consistent with the forward pass)
    in_channels, kernel_size, drop_out, filters = 4, 3, 0.1, 32
    N, L = 2, 16

    key = jax.random.PRNGKey(0)
    kx, kw = jax.random.split(key)

    x = jax.random.normal(kx, (N, in_channels, L), dtype=jnp.float32)

    # Conv1d params: xavier_uniform_ weight, zero bias
    fan_in = in_channels * kernel_size
    fan_out = filters * kernel_size
    bound = math.sqrt(6.0 / (fan_in + fan_out))
    weight = jax.random.uniform(kw, (filters, in_channels, kernel_size),
                                dtype=jnp.float32, minval=-bound, maxval=bound)
    bias = jnp.zeros((filters,), jnp.float32)

    # BatchNorm1d params (fresh module defaults, eval mode)
    gamma = jnp.ones((filters,), jnp.float32)
    beta = jnp.zeros((filters,), jnp.float32)
    running_mean = jnp.zeros((filters,), jnp.float32)
    running_var = jnp.ones((filters,), jnp.float32)

    out = crnn_block_forward(x, weight, bias, gamma, beta,
                             running_mean, running_var)
    jax.block_until_ready(out)
    assert out.shape == (N, filters, L)
    assert out.dtype == jnp.float32

    ref = _reference(x, weight, bias, gamma, beta, running_mean, running_var)
    err = float(jnp.max(jnp.abs(out - ref)))
    assert err < 1e-2, err
    print("KERNEL_OK")
</pallas_src>

<mosaic_0001>
module attributes {stable_mosaic.version = 11 : i64} {
  func.func @_crnn_kernel(%arg0: i32, %arg1: memref<1x4x16xf32, #tpu.memory_space<vmem>>, %arg2: memref<32x13xf32, #tpu.memory_space<vmem>>, %arg3: memref<1x32x16xf32, #tpu.memory_space<vmem>>) attributes {dimension_semantics = [#tpu.dimension_semantics<parallel>], iteration_bounds = array<i64: 2>, scalar_prefetch = 0 : i64, scratch_operands = 0 : i64, tpu.core_type = #tpu.core_type<tc>, window_params = [{transform_indices = @transform_0, window_bounds = array<i64: 1, 4, 16>}, {pipeline_mode = #tpu.pipeline_mode<synchronous>, transform_indices = @transform_1, window_bounds = array<i64: 32, 13>}, {transform_indices = @transform_2, window_bounds = array<i64: 1, 32, 16>}]} {
    %c0 = arith.constant 0 : index
    %c0_0 = arith.constant 0 : index
    %0 = vector.load %arg2[%c0, %c0_0] : memref<32x13xf32, #tpu.memory_space<vmem>>, vector<32x13xf32>
    %cst = arith.constant 1.000000e+00 : f32
    %1 = vector.broadcast %cst : f32 to vector<1x16xf32>
    %c0_1 = arith.constant 0 : index
    %c0_2 = arith.constant 0 : index
    %c0_3 = arith.constant 0 : index
    %2 = vector.load %arg1[%c0_1, %c0_2, %c0_3] : memref<1x4x16xf32, #tpu.memory_space<vmem>>, vector<1x4x16xf32>
    %3 = vector.shape_cast %2 : vector<1x4x16xf32> to vector<4x16xf32>
    %cst_4 = arith.constant 0.000000e+00 : f32
    %4 = vector.broadcast %cst_4 : f32 to vector<4x1xf32>
    %cst_5 = arith.constant 0.000000e+00 : f32
    %5 = vector.broadcast %cst_5 : f32 to vector<4x1xf32>
    %6 = tpu.concatenate %4, %3, %5 in 1 : vector<4x1xf32>, vector<4x16xf32>, vector<4x1xf32> -> vector<4x18xf32>
    %7 = vector.extract_strided_slice %6 {offsets = [0, 0], sizes = [4, 16], strides = [1, 1]} : vector<4x18xf32> to vector<4x16xf32>
    %8 = vector.extract_strided_slice %6 {offsets = [0, 1], sizes = [4, 16], strides = [1, 1]} : vector<4x18xf32> to vector<4x16xf32>
    %9 = vector.extract_strided_slice %6 {offsets = [0, 2], sizes = [4, 16], strides = [1, 1]} : vector<4x18xf32> to vector<4x16xf32>
    %10 = tpu.concatenate %7, %8, %9 in 0 : vector<4x16xf32>, vector<4x16xf32>, vector<4x16xf32> -> vector<12x16xf32>
    %11 = tpu.concatenate %10, %1 in 0 : vector<12x16xf32>, vector<1x16xf32> -> vector<13x16xf32>
    %cst_6 = arith.constant dense<0.000000e+00> : vector<32x16xf32>
    %12 = tpu.matmul %0, %11, %cst_6 {dimension_numbers = #tpu.dot_dimension_numbers<[1], [0], [0], [1], [0, 0, 1, 1], [], []>} : vector<32x13xf32>, vector<13x16xf32>, vector<32x16xf32> -> vector<32x16xf32>
    %cst_7 = arith.constant 0.000000e+00 : f32
    %13 = vector.broadcast %cst_7 : f32 to vector<32x16xf32>
    %14 = arith.maximumf %12, %13 : vector<32x16xf32>
    %c0_8 = arith.constant 0 : index
    %c0_9 = arith.constant 0 : index
    %c0_10 = arith.constant 0 : index
    %15 = vector.load %arg3[%c0_8, %c0_9, %c0_10] : memref<1x32x16xf32, #tpu.memory_space<vmem>>, vector<1x32x16xf32>
    %16 = vector.shape_cast %15 : vector<1x32x16xf32> to vector<32x16xf32>
    %17 = vector.shape_cast %14 : vector<32x16xf32> to vector<1x32x16xf32>
    tpu.vector_store %arg3[%c0_8, %c0_9, %c0_10], %17 {strides = array<i32>} : memref<1x32x16xf32, #tpu.memory_space<vmem>>, vector<1x32x16xf32>,
    return
  }
  func.func @transform_0(%arg0: i32) -> (i32, i32, i32) {
    %c0_i32 = arith.constant 0 : i32
    %c0_i32_0 = arith.constant 0 : i32
    %c0_i32_1 = arith.constant 0 : i32
    return %arg0, %c0_i32, %c0_i32_0 : i32, i32, i32
  }
  func.func @transform_1(%arg0: i32) -> (i32, i32) {
    %c0_i32 = arith.constant 0 : i32
    %c0_i32_0 = arith.constant 0 : i32
    %c0_i32_1 = arith.constant 0 : i32
    return %c0_i32, %c0_i32_0 : i32, i32
  }
  func.func @transform_2(%arg0: i32) -> (i32, i32, i32) {
    %c0_i32 = arith.constant 0 : i32
    %c0_i32_0 = arith.constant 0 : i32
    %c0_i32_1 = arith.constant 0 : i32
    return %arg0, %c0_i32, %c0_i32_0 : i32, i32, i32
  }
}

</mosaic_0001>

<bundles_post_ra>
// kernel: tpu_custom_call.1
= control target key start
LH: loop header
LB: loop body
LE: loop exit
PB: predicated region body
PF: predicated region fallthrough
CT: control target
= control target key end

     0   :  { %s404_s9 = smov 0   ;;  %s441_s0 = inlined_call_operand.vmem [shape: f32[2,4,16], index: 0, kind: input, shape index: {}]   ;;  %s442_s1 = inlined_call_operand.vmem [shape: f32[32,13], index: 1, kind: input, shape index: {}]   ;;  %s443_s2 = inlined_call_operand.vmem [shape: f32[2,32,16], index: 2, kind: output, shape index: {}]  }
   0x1 LB: > { %s331_s10 = sadd.s32 4294967295, %s384_s9   ;;  %p335_p0 = scmp.ge.s32.totalorder %s384_s9, 1  ;;  %s384_s9 = sphi %s404_s9, %s12_s9  }
   0x2   : > { %p111_p1 = scmp.lt.s32.totalorder %s384_s9, 3 }
   0x4   : > { %p112_p2 = pnand %p335_p0, %p111_p1 }
   0x5   : > { %p132_p3 = scmp.lt.s32.totalorder (!%p112_p2), %s331_s10, 1  ;;  %s386_s15 = smov (!%p112_p2), 1  }
   0x6   : > { %115 = sbr.rel (%p112_p2) target bundleno = 450 (0x1c2), region = 28  ;;  %s387_s20 = smov (!%p112_p2), 126  }
   0x7   : > { %s388_s21 = smov (!%p112_p2), 127  }
   0xb   : > { %s445_s10 = smov (!%p132_p3, %s331_s10), 1  ;;  %v141_v1 = vld [vmem:[%s442_s1] sm:$0xff]  ;;  %vm165_vm0 = vcmask 105472   ;;  %v143_v2 = vld [vmem:[%s442_s1 + $0x10] sm:$0xff]  ;;  %vm150_vm1 = vcmask 7168   ;;  %vm152_vm2 = vcmask 138240  }
   0xc   : > { %s336_s11 = sshll.u32 %s445_s10, 2  ;;  %357 = vmatprep.mubr.msk.f32.mxu0 %vm165_vm0, %v141_v1  ;;  %360 = vmatprep.mubr.msk.f32.mxu1 %vm165_vm0, %v143_v2  ;;  %vm162_vm3 = vcmask 1043456   ;;  %vm178_vm4 = vcmask 1044480   ;;  %v142_v11 = vld [vmem:[%s442_s1 + $0x8] sm:$0xff]  ;;  %v144_v12 = vld [vmem:[%s442_s1 + $0x18] sm:$0xff]  ;;  %s346_s26 = sshll.u32 %s445_s10, 5 }
   0xd   : > { %s135_s14 = scalar_lea.vmem %s441_s0, %s336_s11  ;;  %s140_s29 = scalar_lea.vmem %s443_s2, %s346_s26  ;;  %vm271_vm5 = vcmask 130048  }
   0xe   : > { %v145_v0 = vld [vmem:[%s135_s14] sm:$0xf] }
   0xf   : > { %147 = vrot.lane.b32.xlu0 %v145_v0, %s386_s15 }
  0x81   : > { %v148_v3 = vpop.permute.xlu0 %147 }
  0x82   : > { %v151_v4 = vsel %vm150_vm1, 0.0, %v148_v3 }
  0x83   : > { %v153_v5 = vsel %vm152_vm2, %v151_v4, 0.0 }
  0x84   : > { %159 = vrot.lane.b32.xlu0 %v153_v5, %s387_s20  ;;  %v155_v6 = vrot.slane %v153_v5, 4 }
  0x86   : > { %156 = vrot.lane.b32.xlu1 %v155_v6, %s388_s21 }
  0xf6   : > { %v160_v7 = vpop.permute.xlu0 %159 }
  0xf7   : > { %v164_v8 = vsel %vm162_vm3, %v160_v7, 1.0 }
  0xf8   : > { %353 = vmatprep.subr.msk.mxu0 %vm178_vm4, %v164_v8  ;;  %363 = vmatprep.subr.msk.mxu1 %vm178_vm4, %v164_v8  ;;  %v157_v9 = vpop.permute.xlu1 %156 }
  0xf9   : > { %v163_v10 = vsel %vm162_vm3, %v153_v5, %v157_v9  ;;  %354 = vmatpush3.msk.msra.mxu0 %vm178_vm4, %v164_v8  ;;  %365 = vmatpush3.msk.msra.mxu1 %vm178_vm4, %v164_v8 }
  0xfa   : > { %355 = vmatprep.subr.mxu0 %v163_v10  ;;  %364 = vmatprep.subr.mxu1 %v163_v10 }
  0xfb   : > { %356 = vmatpush3.msra.mxu0 %v163_v10  ;;  %366 = vmatpush3.msra.mxu1 %v163_v10 }
  0xfc   : > { %358 = vmatmul.mubr.msk.f32.vlgmr.msra.gmra.mxu0 %vm165_vm0, %v142_v11  ;;  %361 = vmatmul.mubr.msk.f32.vlgmr.msra.gmra.mxu1 %vm165_vm0, %v144_v12 }
 0x1bc   : > { %v359_v13 = vpop.f32.mrf.mxu0  ;;  %v362_v14 = vpop.f32.mrf.mxu1 }
 0x1bd   : > { %v268_v15 = vmax.f32 %v359_v13, 0.0  ;;  %v270_v16 = vmax.f32 %v362_v14, 0.0 }
 0x1be   : > { %v248_v17 = vpop.f32.mrf.mxu0  ;;  %v258_v18 = vpop.f32.mrf.mxu1 }
 0x1bf   : > { %273 = vst.msk [vmem:[%s140_s29 + $0x8] sm:$0xff] %vm271_vm5, %v268_v15  ;;  %275 = vst.msk [vmem:[%s140_s29 + $0x18] sm:$0xff] %vm271_vm5, %v270_v16  ;;  %v267_v19 = vmax.f32 %v248_v17, 0.0  ;;  %v269_v20 = vmax.f32 %v258_v18, 0.0 }
 0x1c1   : > { %272 = vst.msk [vmem:[%s140_s29] sm:$0xff] %vm271_vm5, %v267_v19  ;;  %274 = vst.msk [vmem:[%s140_s29 + $0x10] sm:$0xff] %vm271_vm5, %v269_v20 }
 0x1c2 PF: > { %s12_s9 = sadd.s32 1, %s384_s9  }
 0x1c3   : > { %p9_p4 = scmp.ge.s32.totalorder %s12_s9, 4  }
 0x1c5   :  { %11 = sbr.rel (!%p9_p4) target bundleno = 1 (0x1), region = 58 }

</bundles_post_ra>
